<compile_context>
chip_gen: v7x
topology: tpu7x:2x2x1
jax: 0.10.0
libtpu: 0.0.40
codegen_flags: <defaults>
</compile_context>

<pallas_src>
import jax
import jax.numpy as jnp
from jax.experimental import pallas as pl
from jax.experimental.pallas import tpu as pltpu

# ---- small synthetic dims consistent with the module ----
B = 2              # batch of (bias, target) pairs
N_CLS = 4          # number of classnames (rows of token_prefix / token_suffix)
N_CTX = 4          # learned context tokens (module default n_ctx = 4)
D = 32             # ctx_dim (= clip_model.ln_final.weight.shape[0])
L_PRE = 1          # prefix length (SOT embedding)
L_SUF = 3          # suffix length (class tokens + EOT + padding)
L = L_PRE + N_CTX + L_SUF      # total prompt length = 8


def prompt_learner_kernel(tgt_ref,      # (B,) int32   scalar-prefetch (SMEM)
                          bias_ref,     # (B, D)             VMEM
                          ctx_ref,      # (1, N_CTX*D)       VMEM (ctx, lane-flattened)
                          prefix_ref,   # (N_CLS, L_PRE*D)   VMEM
                          suffix_ref,   # (N_CLS, L_SUF*D)   VMEM
                          out_ref):     # (B, L*D)           VMEM
    # Hoisted for the whole batch: tile bias across lanes once (one value per
    # ctx token) and do the context shift as a single vector add.
    bias_tiled = jnp.tile(bias_ref[...], (1, N_CTX))          # (B, N_CTX*D)
    shifted = ctx_ref[...] + bias_tiled                       # (B, N_CTX*D), bcast over sublanes

    # Dynamic class gathers: one sublane slice per batch row (B = 2, unrolled),
    # assembled into (B, *) slabs so the output is written with ONE unmasked
    # lane-dense (B, L*D) store.
    pre_rows = [prefix_ref[pl.ds(tgt_ref[b], 1), :] for b in range(B)]   # B x (1, L_PRE*D)
    suf_rows = [suffix_ref[pl.ds(tgt_ref[b], 1), :] for b in range(B)]   # B x (1, L_SUF*D)
    pre = jnp.concatenate(pre_rows, axis=0)                   # (B, L_PRE*D)
    suf = jnp.concatenate(suf_rows, axis=0)                   # (B, L_SUF*D)

    out_ref[...] = jnp.concatenate([pre, shifted, suf], axis=1)   # (B, L*D) = (2, 256)


def prompt_learner(bias, target, ctx, token_prefix, token_suffix):
    """bias (B,D), target (B,) int, ctx (N_CTX,D), token_prefix (N_CLS,1,D),
    token_suffix (N_CLS,L_SUF,D)  ->  prompts (B, L, D)."""
    # Layout plumbing only (no compute hoisted): flatten token axes into lanes.
    prefix_flat = token_prefix.reshape(N_CLS, L_PRE * D)
    suffix_flat = token_suffix.reshape(N_CLS, L_SUF * D)
    ctx_flat = ctx.reshape(1, N_CTX * D)
    target = target.astype(jnp.int32)

    out_flat = pl.pallas_call(
        prompt_learner_kernel,
        out_shape=jax.ShapeDtypeStruct((B, L * D), jnp.float32),
        grid_spec=pltpu.PrefetchScalarGridSpec(
            num_scalar_prefetch=1,
            grid=(1,),                                   # whole batch in one step
            in_specs=[
                pl.BlockSpec((B, D), lambda i, tgt: (0, 0)),               # bias
                pl.BlockSpec((1, N_CTX * D), lambda i, tgt: (0, 0)),       # ctx
                pl.BlockSpec((N_CLS, L_PRE * D), lambda i, tgt: (0, 0)),   # prefix
                pl.BlockSpec((N_CLS, L_SUF * D), lambda i, tgt: (0, 0)),   # suffix
            ],
            out_specs=pl.BlockSpec((B, L * D), lambda i, tgt: (0, 0)),
        ),
        compiler_params=pltpu.CompilerParams(
            dimension_semantics=("arbitrary",)),
    )(target, bias, ctx_flat, prefix_flat, suffix_flat)
    return out_flat.reshape(B, L, D)


def reference(bias, target, ctx, token_prefix, token_suffix):
    """Pure-JAX replica of PromptLearner_o.forward."""
    prefix = token_prefix[target]                        # (B, 1, D)
    suffix = token_suffix[target]                        # (B, L_SUF, D)
    ctx_shifted = ctx[None, :, :] + bias[:, None, :]     # (B, N_CTX, D)
    return jnp.concatenate([prefix, ctx_shifted, suffix], axis=1)


if __name__ == "__main__":
    key = jax.random.PRNGKey(0)
    k_ctx, k_pre, k_suf, k_bias, k_tgt = jax.random.split(key, 5)

    ctx = jax.random.normal(k_ctx, (N_CTX, D), jnp.float32) * 0.02   # nn.init.normal_(std=0.02)
    token_prefix = jax.random.normal(k_pre, (N_CLS, L_PRE, D), jnp.float32) * 0.02
    token_suffix = jax.random.normal(k_suf, (N_CLS, L_SUF, D), jnp.float32) * 0.02
    bias = jax.random.normal(k_bias, (B, D), jnp.float32) * 0.1      # meta-net bias
    target = jax.random.randint(k_tgt, (B,), 0, N_CLS, jnp.int32)

    out = jax.block_until_ready(
        prompt_learner(bias, target, ctx, token_prefix, token_suffix))
    ref = reference(bias, target, ctx, token_prefix, token_suffix)

    assert out.shape == (B, L, D)
    if not jnp.allclose(out, ref, atol=1e-5, rtol=1e-5):
        raise AssertionError("Pallas kernel does not match pure-JAX reference")
    print("KERNEL_OK")
</pallas_src>

<mosaic_0001>
module attributes {stable_mosaic.version = 11 : i64} {
  func.func @prompt_learner_kernel(%arg0: i32, %arg1: memref<2xi32, #tpu.memory_space<smem>>, %arg2: memref<2x32xf32, #tpu.memory_space<vmem>>, %arg3: memref<1x128xf32, #tpu.memory_space<vmem>>, %arg4: memref<4x32xf32, #tpu.memory_space<vmem>>, %arg5: memref<4x96xf32, #tpu.memory_space<vmem>>, %arg6: memref<2x256xf32, #tpu.memory_space<vmem>>) attributes {dimension_semantics = [#tpu.dimension_semantics<arbitrary>], iteration_bounds = array<i64: 1>, scalar_prefetch = 1 : i64, scratch_operands = 0 : i64, tpu.core_type = #tpu.core_type<tc>, window_params = [{pipeline_mode = #tpu.pipeline_mode<synchronous>, transform_indices = @transform_0, window_bounds = array<i64: 2, 32>}, {pipeline_mode = #tpu.pipeline_mode<synchronous>, transform_indices = @transform_1, window_bounds = array<i64: 1, 128>}, {pipeline_mode = #tpu.pipeline_mode<synchronous>, transform_indices = @transform_2, window_bounds = array<i64: 4, 32>}, {pipeline_mode = #tpu.pipeline_mode<synchronous>, transform_indices = @transform_3, window_bounds = array<i64: 4, 96>}, {pipeline_mode = #tpu.pipeline_mode<synchronous>, transform_indices = @transform_4, window_bounds = array<i64: 2, 256>}]} {
    %c0 = arith.constant 0 : index
    %c0_0 = arith.constant 0 : index
    %0 = vector.load %arg2[%c0, %c0_0] : memref<2x32xf32, #tpu.memory_space<vmem>>, vector<2x32xf32>
    %1 = tpu.concatenate %0, %0, %0, %0 in 1 : vector<2x32xf32>, vector<2x32xf32>, vector<2x32xf32>, vector<2x32xf32> -> vector<2x128xf32>
    %c0_1 = arith.constant 0 : index
    %c0_2 = arith.constant 0 : index
    %2 = vector.load %arg3[%c0_1, %c0_2] : memref<1x128xf32, #tpu.memory_space<vmem>>, vector<1x128xf32>
    %3 = vector.broadcast %2 : vector<1x128xf32> to vector<2x128xf32>
    %4 = arith.addf %3, %1 : vector<2x128xf32>
    %c0_3 = arith.constant 0 : index
    %5 = memref.load %arg1[%c0_3] : memref<2xi32, #tpu.memory_space<smem>>
    %6 = arith.index_cast %5 : i32 to index
    %c0_4 = arith.constant 0 : index
    %7 = vector.load %arg4[%6, %c0_4] : memref<4x32xf32, #tpu.memory_space<vmem>>, vector<1x32xf32>
    %c1 = arith.constant 1 : index
    %8 = memref.load %arg1[%c1] : memref<2xi32, #tpu.memory_space<smem>>
    %9 = arith.index_cast %8 : i32 to index
    %c0_5 = arith.constant 0 : index
    %10 = vector.load %arg4[%9, %c0_5] : memref<4x32xf32, #tpu.memory_space<vmem>>, vector<1x32xf32>
    %c0_6 = arith.constant 0 : index
    %11 = memref.load %arg1[%c0_6] : memref<2xi32, #tpu.memory_space<smem>>
    %12 = arith.index_cast %11 : i32 to index
    %c0_7 = arith.constant 0 : index
    %13 = vector.load %arg5[%12, %c0_7] : memref<4x96xf32, #tpu.memory_space<vmem>>, vector<1x96xf32>
    %c1_8 = arith.constant 1 : index
    %14 = memref.load %arg1[%c1_8] : memref<2xi32, #tpu.memory_space<smem>>
    %15 = arith.index_cast %14 : i32 to index
    %c0_9 = arith.constant 0 : index
    %16 = vector.load %arg5[%15, %c0_9] : memref<4x96xf32, #tpu.memory_space<vmem>>, vector<1x96xf32>
    %17 = tpu.concatenate %7, %10 in 0 : vector<1x32xf32>, vector<1x32xf32> -> vector<2x32xf32>
    %18 = tpu.concatenate %13, %16 in 0 : vector<1x96xf32>, vector<1x96xf32> -> vector<2x96xf32>
    %19 = tpu.concatenate %17, %4, %18 in 1 : vector<2x32xf32>, vector<2x128xf32>, vector<2x96xf32> -> vector<2x256xf32>
    %c0_10 = arith.constant 0 : index
    %c0_11 = arith.constant 0 : index
    %20 = vector.load %arg6[%c0_10, %c0_11] : memref<2x256xf32, #tpu.memory_space<vmem>>, vector<2x256xf32>
    tpu.vector_store %arg6[%c0_10, %c0_11], %19 {strides = array<i32>} : memref<2x256xf32, #tpu.memory_space<vmem>>, vector<2x256xf32>,
    return
  }
  func.func @transform_0(%arg0: i32, %arg1: memref<2xi32, #tpu.memory_space<smem>>) -> (i32, i32) {
    %c0_i32 = arith.constant 0 : i32
    %c0_i32_0 = arith.constant 0 : i32
    %c0_i32_1 = arith.constant 0 : i32
    return %c0_i32, %c0_i32_0 : i32, i32
  }
  func.func @transform_1(%arg0: i32, %arg1: memref<2xi32, #tpu.memory_space<smem>>) -> (i32, i32) {
    %c0_i32 = arith.constant 0 : i32
    %c0_i32_0 = arith.constant 0 : i32
    %c0_i32_1 = arith.constant 0 : i32
    return %c0_i32, %c0_i32_0 : i32, i32
  }
  func.func @transform_2(%arg0: i32, %arg1: memref<2xi32, #tpu.memory_space<smem>>) -> (i32, i32) {
    %c0_i32 = arith.constant 0 : i32
    %c0_i32_0 = arith.constant 0 : i32
    %c0_i32_1 = arith.constant 0 : i32
    return %c0_i32, %c0_i32_0 : i32, i32
  }
  func.func @transform_3(%arg0: i32, %arg1: memref<2xi32, #tpu.memory_space<smem>>) -> (i32, i32) {
    %c0_i32 = arith.constant 0 : i32
    %c0_i32_0 = arith.constant 0 : i32
    %c0_i32_1 = arith.constant 0 : i32
    return %c0_i32, %c0_i32_0 : i32, i32
  }
  func.func @transform_4(%arg0: i32, %arg1: memref<2xi32, #tpu.memory_space<smem>>) -> (i32, i32) {
    %c0_i32 = arith.constant 0 : i32
    %c0_i32_0 = arith.constant 0 : i32
    %c0_i32_1 = arith.constant 0 : i32
    return %c0_i32, %c0_i32_0 : i32, i32
  }
}

</mosaic_0001>

<bundles_post_ra>
// kernel: tpu_custom_call.1
= control target key start
LH: loop header
LB: loop body
LE: loop exit
PB: predicated region body
PF: predicated region fallthrough
CT: control target
= control target key end

     0   :  { %s234_s0 = inlined_call_operand.hbm [shape: s32[2], index: 0, kind: input, shape index: {}]   ;;  %s235_s1 = inlined_call_operand.vmem [shape: f32[2,32], index: 1, kind: input, shape index: {}]   ;;  %s236_s2 = inlined_call_operand.vmem [shape: f32[1,128], index: 2, kind: input, shape index: {}]   ;;  %s237_s3 = inlined_call_operand.vmem [shape: f32[4,32], index: 3, kind: input, shape index: {}]   ;;  %s238_s4 = inlined_call_operand.vmem [shape: f32[4,96], index: 4, kind: input, shape index: {}]   ;;  %s239_s5 = inlined_call_operand.hbm [shape: f32[2,256], index: 5, kind: output, shape index: {}]  }
   0x1   :  { %s115_s20 = scalar_lea.hbm %s234_s0, 16 }
   0x2   :  { %p116_p0 = scmp.ne.s32.totalorder %s234_s0, %s115_s20  ;;  %p119_p1 = scmp.lt.u32.totalorder %s115_s20, %s234_s0 }
   0x4   :  { %p121_p2 = pnand %p119_p1, %p116_p0 }
   0x6   :  { %124 = shalt.err (!%p121_p2)  }
   0x7   :  { %s151_s25 = smov [#allocation3]  }
   0x8   :  { %11 = dma.hbm_to_smem %s234_s0, 16, %s151_s25, [#allocation2] }
   0x9   :  { %147 = dma.done.wait [#allocation2], 16 }
   0xa   :  { %148 = vsyncadd [#allocation2], 4294967280 }
   0xb   :  { %13 = sfence }
   0xc   :  { %v23_v0 = vld [vmem:[%s235_s1] sm:$0x3]  ;;  %s152_s30 = smov 32   ;;  %s48_s6 = sld [smem:[#allocation3]] }
   0xd   :  { %25 = vrot.lane.b32.xlu0 %v23_v0, %s152_s30  ;;  %s153_s7 = smov 96   ;;  %s108_s8 = sld [smem:[#allocation3 + $0x1]] }
   0xe   :  { %31 = vrot.lane.b32.xlu1 %v23_v0, %s153_s7 }
   0xf   :  { %14 = vsyncpa [#allocation5], 0  ;;  %s154_s9 = smov 64   ;;  %vm61_vm0 = vcmask 1040384   ;;  %vm34_vm1 = vcmask 261120   ;;  %vm36_vm2 = vcmask 523264  }
  0x10   :  { %vm38_vm3 = vcmask 785408   ;;  %v107_v13 = vld [vmem:[%s236_s2] ss:$0 sm:$0xff] }
  0x11   :  { %28 = vrot.lane.b32.xlu0 %v23_v0, %s154_s9 }
  0x12   :  { %s54_s0 = scalar_lea.vmem %s238_s4, %s48_s6  ;;  %s49_s14 = scalar_lea.vmem %s237_s3, %s48_s6 }
  0x13   :  { %v55_v1 = vld [vmem:[%s54_s0] sm:$0x1]  ;;  %s56_s16 = scalar_lea.vmem %s238_s4, %s108_s8  ;;  %s52_s19 = scalar_lea.vmem %s237_s3, %s108_s8 }
  0x14   :  { %v57_v2 = vld [vmem:[%s56_s16] sm:$0x1]  ;;  %s155_s3 = smov [#allocation4]  }
  0x15   :  { %v50_v3 = vld [vmem:[%s49_s14] sm:$0x1]  ;;  %v64_v5 = vrot.slane %v57_v2, 7  ;;  %s95_s21 = sshll.u32 %s155_s3, 4  ;;  %s96_s21 = int_to_ptr.vmem [resolvable:$true] %s95_s21 }
  0x16   :  { %v53_v4 = vld [vmem:[%s52_s19] sm:$0x1]  ;;  %s125_s22 = scalar_lea.vmem %s96_s21, 64  ;;  %p130_p4 = scmp.lt.s32.totalorder %s96_s21, %s96_s21 }
  0x17   :  { %v59_v6 = vrot.slane %v53_v4, 7  ;;  %v66_v7 = vsel %vm61_vm0, %v55_v1, %v64_v5  ;;  %p126_p3 = scmp.ne.s32.totalorder %s96_s21, %s125_s22  ;;  %p131_p5 = scmp.lt.s32.totalorder %s125_s22, %s125_s22 }
  0x18   :  { %72 = vrot.lane.b32.xlu0 %v66_v7, %s152_s30 }
  0x19   :  { %v62_v8 = vsel %vm61_vm0, %v50_v3, %v59_v6  ;;  %p132_p6 = por %p131_p5, %p130_p4 }
  0x1b   :  { %p133_p7 = pnand %p132_p6, %p126_p3 }
  0x7f   :  { %v26_v9 = vpop.permute.xlu0 %25 }
  0x80   :  { %v32_v10 = vpop.permute.xlu1 %31  ;;  %v35_v11 = vsel %vm34_vm1, %v23_v0, %v26_v9 }
  0x83   :  { %v29_v12 = vpop.permute.xlu0 %28 }
  0x84   :  { %v37_v14 = vsel %vm36_vm2, %v35_v11, %v29_v12 }
  0x85   :  { %v39_v15 = vsel %vm38_vm3, %v37_v14, %v32_v10 }
  0x86   :  { %v47_v16 = vadd.f32 %v107_v13, %v39_v15 }
  0x88   :  { %68 = vrot.lane.b32.xlu1 %v47_v16, %s152_s30 }
  0x8a   :  { %v73_v17 = vpop.permute.xlu0 %72 }
  0xfa   :  { %v69_v18 = vpop.permute.xlu1 %68 }
  0xfb   :  { %v75_v19 = vsel %vm34_vm1, %v62_v8, %v69_v18  ;;  %v76_v20 = vsel %vm34_vm1, %v69_v18, %v73_v17 }
  0xfc   :  { %v79_v21 = vcombine.low %v75_v19, %v76_v20 }
  0xfe   :  { %109 = vst.sshfl [vmem:[#allocation4] sm:$0x33 pattern:$0x76325410] %v79_v21 }
  0xff   :  { %136 = shalt.err (!%p133_p7)
}
 0x100   :  { %s137_s24 = scalar_lea.hbm %s239_s5, 64 }
 0x101   :  { %p138_p8 = scmp.ne.s32.totalorder %s239_s5, %s137_s24  ;;  %p141_p9 = scmp.lt.u32.totalorder %s137_s24, %s239_s5 }
 0x103   :  { %p143_p10 = pnand %p141_p9, %p138_p8 }
 0x105   :  { %146 = shalt.err (!%p143_p10)
}
 0x106   :  { %98 = dma.vmem_to_hbm [thread:$0]  %s96_s21, 64, %s239_s5, [#allocation5]  }
 0x107   :  { %149 = dma.done.wait [#allocation5], 64  }
 0x108   :  { %150 = vsyncadd [#allocation5], 4294967232 }
 0x109   :  { %102 = vsyncpa [#allocation5], 1 }

</bundles_post_ra>
